<compile_context>
chip_gen: v5e
topology: v5e:2x2
jax: 0.10.0
libtpu: 0.0.40
codegen_flags: <defaults>
</compile_context>

<pallas_src>
import functools

import jax
import jax.numpy as jnp
import numpy as np
from jax.experimental import pallas as pl
from jax.experimental.pallas import tpu as pltpu


# -----------------------------------------------------------------------------
# Small helpers
# -----------------------------------------------------------------------------
def _round_up(v, m):
    return ((v + m - 1) // m) * m


def _build_fused_weight(a_list, a2_list, d_in, d_pad, c_pad):
    """Combined bf16 weight [aM | aP] of shape (d_pad, 2*c_pad); see module docstring."""
    nheads = len(a_list)
    nhid = a_list[0].shape[0]
    fh = nheads * nhid
    aM = jnp.zeros((d_pad, c_pad), jnp.float32)
    aP = jnp.zeros((d_pad, c_pad), jnp.float32)
    for h, (a, a2) in enumerate(zip(a_list, a2_list)):
        aT = jnp.asarray(a, jnp.float32).T                         # (d_in, nhid)
        pcol = aT @ jnp.asarray(a2, jnp.float32).T                 # (d_in, 1)
        aM = aM.at[:d_in, h * nhid:(h + 1) * nhid].set(aT)
        aM = aM.at[d_in, fh + h].set(1.0)                          # ones row -> denom col
        aP = aP.at[:d_in, h * nhid:(h + 1) * nhid].set(
            jnp.broadcast_to(pcol, (d_in, nhid)))
        aP = aP.at[:d_in, fh + h].set(pcol[:, 0])
    return jnp.concatenate([aM, aP], axis=1).astype(jnp.bfloat16)


def _build_norm_selector(nheads, nhid, c_pad, fout_pad):
    """0/1 selector S (c_pad, fout_pad): S[fh+h, c] = 1 iff column c belongs to head h."""
    fh = nheads * nhid
    sel = np.zeros((c_pad, fout_pad), np.float32)
    for c in range(fh):
        sel[fh + c // nhid, c] = 1.0
    return jnp.asarray(sel)


def _compiler_params(semantics, vmem_bytes):
    # Explicit VMEM limit with headroom (v7x: 64 MiB physical, 32 MiB scoped default).
    limit = int(min(max(2 * vmem_bytes + (1 << 20), 16 << 20), 48 << 20))
    return pltpu.CompilerParams(dimension_semantics=semantics,
                                vmem_limit_bytes=limit)


# -----------------------------------------------------------------------------
# Pallas kernels
# -----------------------------------------------------------------------------
def _edge_we_kernel(edge_h_ref, w_ref, out_ref, *, alpha):
    """Per-edge fused projection + attention weights for ALL heads (run once per edge).

    edge_h_ref : (tE, d_pad)       bf16  [h_dst | h_src | rel | 1 | 0-pad]
    w_ref      : (d_pad, 2*c_pad)  bf16  combined weight [aM | aP]
    out_ref    : (tE, c_pad)       bf16  edge_we = exp(-LeakyReLU(P)) * M
    """
    c_pad = out_ref.shape[1]
    mp = jnp.dot(edge_h_ref[...], w_ref[...],
                 preferred_element_type=jnp.float32)                 # (tE, 2*c_pad) f32
    m = mp[:, :c_pad]                                                # features | ones | 0
    p = mp[:, c_pad:]                                                # replicated powers
    p = -jnp.where(p >= 0.0, p, alpha * p)                           # -LeakyReLU
    out_ref[...] = (jnp.exp(p) * m).astype(out_ref.dtype)


def _scatter_kernel(target_ref, edge_we_ref, sel_ref, out_ref, acc_ref, *, apply_elu):
    """One (node-tile, edge-tile) step: one-hot segment-sum, then normalize + ELU.

    target_ref  : (1, tE)           int32  destination node per edge (-1 = padding)
    edge_we_ref : (tE, c_pad)       bf16   weighted features + per-head denominators
    sel_ref     : (c_pad, fout_pad) f32    0/1 normalization selector
    out_ref     : (tN, fout_pad)    f32    lane-dense output slab
    acc_ref     : (tN, c_pad)       f32    VMEM accumulator across edge tiles
    """
    i = pl.program_id(0)
    k = pl.program_id(1)
    tile_n = acc_ref.shape[0]
    tile_e = edge_we_ref.shape[0]

    @pl.when(k == 0)
    def _init():
        acc_ref[...] = jnp.zeros_like(acc_ref)

    # One-hot scatter over destination nodes (MXU segment-sum).  Compare against a
    # constant local iota; shift the (1, tE) target row instead of the whole tile.
    tgt_local = target_ref[...] - i * tile_n                          # (1, tE)
    row_ids = jax.lax.broadcasted_iota(jnp.int32, (tile_n, tile_e), 0)
    one_hot = (row_ids == tgt_local).astype(jnp.bfloat16)             # (tN, tE)
    acc_ref[...] += jnp.dot(one_hot, edge_we_ref[...],
                            preferred_element_type=jnp.float32)

    @pl.when(k == pl.num_programs(1) - 1)
    def _finalize():
        acc = acc_ref[...]
        fout_pad = out_ref.shape[1]
        # Full-width approx reciprocal (EUP slot) + selector matmul broadcasts each
        # head's denominator reciprocal over that head's feature columns.
        safe = jnp.where(acc == 0.0, 1e-12, acc)
        recip = pl.reciprocal(safe, approx=True)                      # (tN, c_pad)
        inv_full = jnp.dot(recip, sel_ref[...],
                           preferred_element_type=jnp.float32)        # (tN, fout_pad)
        out = acc[:, :fout_pad] * inv_full
        if apply_elu:
            out = jnp.where(out > 0.0, out, jnp.exp(out) - 1.0)       # ELU(alpha=1)
        out_ref[...] = out


# -----------------------------------------------------------------------------
# Layer wrapper: two pallas_calls per SpGraphAttentionLayer (all heads fused)
# -----------------------------------------------------------------------------
def fused_gat_layer(x, edge, edge_embed, edge_nhop, edge_embed_nhop,
                    a_list, a2_list, *, alpha, apply_elu,
                    tile_n=128, tile_e=256):
    assert tile_e % 128 == 0 and tile_n % 8 == 0
    n_nodes = x.shape[0]
    nheads = len(a_list)
    nhid = a_list[0].shape[0]
    fh = nheads * nhid

    edge_all = jnp.concatenate([edge, edge_nhop], axis=1)              # (2, E)
    emb_all = jnp.concatenate([edge_embed, edge_embed_nhop], axis=0)   # (E, R)
    e_tot = edge_all.shape[1]
    d_in = 2 * x.shape[1] + emb_all.shape[1]

    # Per-edge feature [h_dst | h_src | rel | 1] gathered directly in bf16
    # (the trailing ones column feeds the per-head denominator columns of aM).
    x_bf = x.astype(jnp.bfloat16)
    edge_h = jnp.concatenate(
        [x_bf[edge_all[0]], x_bf[edge_all[1]], emb_all.astype(jnp.bfloat16),
         jnp.ones((e_tot, 1), jnp.bfloat16)], axis=1)                  # (E, d_in+1)

    # Lane-dense, (8,128)-legal padding.
    d_pad = _round_up(d_in + 1, 128)
    c_pad = _round_up(fh + nheads, 128)        # features | denominators | 0-pad
    fout_pad = _round_up(fh, 128)
    e_pad = _round_up(max(e_tot, tile_e), tile_e)
    n_pad = _round_up(max(n_nodes, tile_n), tile_n)

    edge_h_p = jnp.pad(edge_h, ((0, e_pad - e_tot), (0, d_pad - (d_in + 1))))
    w_comb = _build_fused_weight(a_list, a2_list, d_in, d_pad, c_pad)  # (d_pad, 2*c_pad)
    # Padded edges get target = -1 -> never match the one-hot -> contribute 0.
    target_p = jnp.pad(edge_all[0].astype(jnp.int32), (0, e_pad - e_tot),
                       constant_values=-1)[None, :]                    # (1, E_pad)
    sel = _build_norm_selector(nheads, nhid, c_pad, fout_pad)          # (c_pad, fout_pad)

    # ------------- phase 1: per-edge projection + attention weights (once) -----
    edge_vmem = (2 * tile_e * d_pad * 2 + 2 * d_pad * 2 * c_pad * 2
                 + 2 * tile_e * c_pad * 2)
    edge_we = pl.pallas_call(
        functools.partial(_edge_we_kernel, alpha=alpha),
        out_shape=jax.ShapeDtypeStruct((e_pad, c_pad), jnp.bfloat16),
        grid=(e_pad // tile_e,),
        in_specs=[pl.BlockSpec((tile_e, d_pad), lambda k: (k, 0)),
                  pl.BlockSpec((d_pad, 2 * c_pad), lambda k: (0, 0))],
        out_specs=pl.BlockSpec((tile_e, c_pad), lambda k: (k, 0)),
        compiler_params=_compiler_params(("parallel",), edge_vmem),
    )(edge_h_p, w_comb)

    # ------------- phase 2: one-hot scatter + normalize + ELU ------------------
    scat_vmem = (2 * tile_e * 4 + 2 * tile_e * c_pad * 2
                 + 2 * c_pad * fout_pad * 4 + 2 * tile_n * fout_pad * 4
                 + tile_n * c_pad * 4)
    out = pl.pallas_call(
        functools.partial(_scatter_kernel, apply_elu=apply_elu),
        out_shape=jax.ShapeDtypeStruct((n_pad, fout_pad), jnp.float32),
        grid_spec=pltpu.PrefetchScalarGridSpec(
            num_scalar_prefetch=0,
            grid=(n_pad // tile_n, e_pad // tile_e),
            in_specs=[
                pl.BlockSpec((1, tile_e), lambda i, k: (0, k)),         # edge targets
                pl.BlockSpec((tile_e, c_pad), lambda i, k: (k, 0)),     # edge_we
                pl.BlockSpec((c_pad, fout_pad), lambda i, k: (0, 0)),   # norm selector
            ],
            out_specs=pl.BlockSpec((tile_n, fout_pad), lambda i, k: (i, 0)),
            scratch_shapes=[pltpu.VMEM((tile_n, c_pad), jnp.float32)],
        ),
        compiler_params=_compiler_params(("parallel", "arbitrary"), scat_vmem),
    )(target_p, edge_we, sel)
    return out[:n_nodes, :fh]


# -----------------------------------------------------------------------------
# SpGAT forward (mirrors SpGAT.forward; Corpus_/batch_inputs are unused there)
# -----------------------------------------------------------------------------
def spgat_forward(params, entity_embeddings, relation_embed,
                  edge_list, edge_type, edge_embed,
                  edge_list_nhop, edge_type_nhop, *, alpha,
                  tile_n=128, tile_e=256):
    x = entity_embeddings
    edge_embed_nhop = (relation_embed[edge_type_nhop[:, 0]]
                       + relation_embed[edge_type_nhop[:, 1]])

    # All concat=True heads fused into the two-kernel layer (ELU applied inside).
    a_list = [a for (a, _) in params["heads"]]
    a2_list = [a2 for (_, a2) in params["heads"]]
    x = fused_gat_layer(x, edge_list, edge_embed, edge_list_nhop, edge_embed_nhop,
                        a_list, a2_list, alpha=alpha, apply_elu=True,
                        tile_n=tile_n, tile_e=tile_e)
    # dropout_layer -> identity (eval mode)

    # Tiny (R, rel_dim) x (rel_dim, H*nhid) projection: per perf review a single-block
    # pallas_call only adds launch overhead here, so use a plain XLA dot.
    out_relation_1 = jnp.dot(relation_embed, params["W"],
                             preferred_element_type=jnp.float32)       # (R, H*nhid)

    edge_embed2 = out_relation_1[edge_type]
    edge_embed_nhop2 = (out_relation_1[edge_type_nhop[:, 0]]
                        + out_relation_1[edge_type_nhop[:, 1]])

    # out_att has concat=False (no internal ELU); SpGAT applies F.elu afterwards,
    # so apply_elu=True reproduces the composed math exactly.
    a_out, a2_out = params["out_att"]
    x = fused_gat_layer(x, edge_list, edge_embed2, edge_list_nhop, edge_embed_nhop2,
                        [a_out], [a2_out], alpha=alpha, apply_elu=True,
                        tile_n=tile_n, tile_e=tile_e)
    return x, out_relation_1


# -----------------------------------------------------------------------------
# Pure-JAX reference.  mirror=True applies the kernel's bf16 rounding at the
# MXU-operand boundaries (structural check); mirror=False is the original f32
# module math (norm-level sanity check).
# -----------------------------------------------------------------------------
def _maybe_round_bf16(v, mirror):
    return v.astype(jnp.bfloat16).astype(jnp.float32) if mirror else v


def _ref_layer(x, edge, edge_embed, edge_nhop, edge_embed_nhop, a_list, a2_list,
               *, alpha, apply_elu, mirror):
    n_nodes = x.shape[0]
    nheads = len(a_list)
    nhid = a_list[0].shape[0]
    edge_all = jnp.concatenate([edge, edge_nhop], axis=1)
    emb_all = jnp.concatenate([edge_embed, edge_embed_nhop], axis=0)
    edge_h = jnp.concatenate([x[edge_all[0]], x[edge_all[1]], emb_all],
                             axis=1).astype(jnp.float32)
    edge_h_r = _maybe_round_bf16(edge_h, mirror)
    seg = edge_all[0]
    outs = []
    for h in range(nheads):
        aT = jnp.asarray(a_list[h], jnp.float32).T                 # (d_in, nhid)
        a2 = jnp.asarray(a2_list[h], jnp.float32)                  # (1, nhid)
        m = edge_h_r @ _maybe_round_bf16(aT, mirror)               # (E, nhid)
        if mirror:   # kernel folds a2 into the projection weight
            p = edge_h_r @ _maybe_round_bf16(aT @ a2.T, mirror)    # (E, 1)
        else:        # original module order: a2 @ (a @ edge_h)
            p = m @ a2.T
        p = -jnp.where(p >= 0.0, p, alpha * p)
        e = jnp.exp(p)                                             # (E, 1)
        w = _maybe_round_bf16(e * m, mirror)                       # stored bf16 edge_we
        e_r = _maybe_round_bf16(e, mirror)
        h_sum = jnp.zeros((n_nodes, nhid), jnp.float32).at[seg].add(w)
        e_sum = jnp.zeros((n_nodes, 1), jnp.float32).at[seg].add(e_r)
        e_sum = jnp.where(e_sum == 0.0, 1e-12, e_sum)
        outs.append(h_sum / e_sum)
    out = jnp.concatenate(outs, axis=1)
    if apply_elu:
        out = jnp.where(out > 0.0, out, jnp.exp(out) - 1.0)
    return out


def _ref_forward(params, x, relation_embed, edge_list, edge_type, edge_embed,
                 edge_list_nhop, edge_type_nhop, *, alpha, mirror):
    een = relation_embed[edge_type_nhop[:, 0]] + relation_embed[edge_type_nhop[:, 1]]
    a_list = [a for (a, _) in params["heads"]]
    a2_list = [a2 for (_, a2) in params["heads"]]
    h = _ref_layer(x, edge_list, edge_embed, edge_list_nhop, een, a_list, a2_list,
                   alpha=alpha, apply_elu=True, mirror=mirror)
    out_rel = jnp.dot(relation_embed, params["W"],
                      preferred_element_type=jnp.float32)
    ee2 = out_rel[edge_type]
    een2 = out_rel[edge_type_nhop[:, 0]] + out_rel[edge_type_nhop[:, 1]]
    a_out, a2_out = params["out_att"]
    h = _ref_layer(h, edge_list, ee2, edge_list_nhop, een2, [a_out], [a2_out],
                   alpha=alpha, apply_elu=True, mirror=mirror)
    return h, out_rel


# -----------------------------------------------------------------------------
# Deterministic parameter init (shapes from SpGAT.__init__ / SpGraphAttentionLayer)
# -----------------------------------------------------------------------------
def _xavier_uniform(key, shape, gain):
    fan_out, fan_in = shape[0], shape[1]
    bound = gain * (6.0 / (fan_in + fan_out)) ** 0.5
    return jax.random.uniform(key, shape, jnp.float32, -bound, bound)


def _xavier_normal(key, shape, gain):
    fan_out, fan_in = shape[0], shape[1]
    std = gain * (2.0 / (fan_in + fan_out)) ** 0.5
    return std * jax.random.normal(key, shape, jnp.float32)


def init_spgat_params(key, nfeat, nhid, relation_dim, nheads):
    keys = jax.random.split(key, 2 * nheads + 3)
    heads = []
    for h in range(nheads):
        a = _xavier_normal(keys[2 * h], (nhid, 2 * nfeat + relation_dim), 1.414)
        a2 = _xavier_normal(keys[2 * h + 1], (1, nhid), 1.414)
        heads.append((a, a2))
    W = _xavier_uniform(keys[2 * nheads], (relation_dim, nheads * nhid), 1.414)
    in_out = nheads * nhid
    a_out = _xavier_normal(keys[2 * nheads + 1], (in_out, 2 * in_out + in_out), 1.414)
    a2_out = _xavier_normal(keys[2 * nheads + 2], (1, in_out), 1.414)
    return {"heads": heads, "W": W, "out_att": (a_out, a2_out)}


# -----------------------------------------------------------------------------
# Main
# -----------------------------------------------------------------------------
if __name__ == "__main__":
    # Small but non-trivial config: 2 node tiles (even count -> both v7x TensorCores
    # busy on the parallel axis) and 2 edge tiles (exercises the accumulator
    # init/finalize path and the edge-kernel grid).
    N_NODES, NFEAT, NHID, REL_DIM, NHEADS = 200, 16, 8, 8, 2
    N_REL, N_EDGES, N_EDGES_NHOP = 6, 384, 128
    ALPHA = 0.2                                 # dropout unused (eval mode)
    TILE_N, TILE_E = 128, 256                   # use 256 / 512 for production graphs

    root = jax.random.PRNGKey(0)
    kp, ke, kr, k1, k2, k3, k4 = jax.random.split(root, 7)

    params = init_spgat_params(kp, NFEAT, NHID, REL_DIM, NHEADS)

    entity_embeddings = jax.random.normal(ke, (N_NODES, NFEAT), jnp.float32)
    relation_embed = jax.random.normal(kr, (N_REL, REL_DIM), jnp.float32)
    edge_list = jax.random.randint(k1, (2, N_EDGES), 0, N_NODES, jnp.int32)
    edge_type = jax.random.randint(k2, (N_EDGES,), 0, N_REL, jnp.int32)
    edge_embed = relation_embed[edge_type]                        # (E, REL_DIM)
    edge_list_nhop = jax.random.randint(k3, (2, N_EDGES_NHOP), 0, N_NODES, jnp.int32)
    edge_type_nhop = jax.random.randint(k4, (N_EDGES_NHOP, 2), 0, N_REL, jnp.int32)

    x_out, out_rel = spgat_forward(
        params, entity_embeddings, relation_embed,
        edge_list, edge_type, edge_embed,
        edge_list_nhop, edge_type_nhop, alpha=ALPHA,
        tile_n=TILE_N, tile_e=TILE_E)
    jax.block_until_ready((x_out, out_rel))

    assert x_out.shape == (N_NODES, NHEADS * NHID)
    assert out_rel.shape == (N_REL, NHEADS * NHID)

    # (1) Structural check: reference with the kernel's bf16 MXU-operand rounding
    #     (validates head fusion, weight folding, padding, tiling, one-hot scatter,
    #     selector-matmul normalization).
    x_mir, rel_mir = _ref_forward(
        params, entity_embeddings, relation_embed,
        edge_list, edge_type, edge_embed,
        edge_list_nhop, edge_type_nhop, alpha=ALPHA, mirror=True)
    assert jnp.allclose(out_rel, rel_mir, rtol=1e-5, atol=1e-5)
    assert jnp.allclose(x_out, x_mir, rtol=5e-2, atol=5e-2)

    # (2) Sanity vs the pure-f32 original module math (norm-level; the kernel
    #     intentionally uses bf16 MXU operands + approx reciprocal).
    x_f32, _ = _ref_forward(
        params, entity_embeddings, relation_embed,
        edge_list, edge_type, edge_embed,
        edge_list_nhop, edge_type_nhop, alpha=ALPHA, mirror=False)
    rel_err = jnp.linalg.norm(x_out - x_f32) / jnp.linalg.norm(x_f32)
    assert float(rel_err) < 0.15

    print("KERNEL_OK")
</pallas_src>

<mosaic_0001>
module attributes {stable_mosaic.version = 11 : i64} {
  func.func @_edge_we_kernel(%arg0: i32, %arg1: memref<256x128xbf16, #tpu.memory_space<vmem>>, %arg2: memref<128x256xbf16, #tpu.memory_space<vmem>>, %arg3: memref<256x128xbf16, #tpu.memory_space<vmem>>) attributes {dimension_semantics = [#tpu.dimension_semantics<parallel>], iteration_bounds = array<i64: 2>, scalar_prefetch = 0 : i64, scratch_operands = 0 : i64, tpu.core_type = #tpu.core_type<tc>, window_params = [{transform_indices = @transform_0, window_bounds = array<i64: 256, 128>}, {pipeline_mode = #tpu.pipeline_mode<synchronous>, transform_indices = @transform_1, window_bounds = array<i64: 128, 256>}, {transform_indices = @transform_2, window_bounds = array<i64: 256, 128>}]} {
    %c0 = arith.constant 0 : index
    %c0_0 = arith.constant 0 : index
    %0 = vector.load %arg1[%c0, %c0_0] : memref<256x128xbf16, #tpu.memory_space<vmem>>, vector<256x128xbf16>
    %c0_1 = arith.constant 0 : index
    %c0_2 = arith.constant 0 : index
    %1 = vector.load %arg2[%c0_1, %c0_2] : memref<128x256xbf16, #tpu.memory_space<vmem>>, vector<128x256xbf16>
    %cst = arith.constant dense<0.000000e+00> : vector<256x256xf32>
    %2 = tpu.matmul %0, %1, %cst {dimension_numbers = #tpu.dot_dimension_numbers<[1], [0], [0], [1], [0, 0, 1, 1], [], []>} : vector<256x128xbf16>, vector<128x256xbf16>, vector<256x256xf32> -> vector<256x256xf32>
    %3 = vector.extract_strided_slice %2 {offsets = [0, 0], sizes = [256, 128], strides = [1, 1]} : vector<256x256xf32> to vector<256x128xf32>
    %4 = vector.extract_strided_slice %2 {offsets = [0, 128], sizes = [256, 128], strides = [1, 1]} : vector<256x256xf32> to vector<256x128xf32>
    %cst_3 = arith.constant 0.000000e+00 : f32
    %5 = vector.broadcast %cst_3 : f32 to vector<256x128xf32>
    %6 = arith.cmpf oge, %4, %5 : vector<256x128xf32>
    %cst_4 = arith.constant 2.000000e-01 : f32
    %7 = vector.broadcast %cst_4 : f32 to vector<256x128xf32>
    %8 = arith.mulf %7, %4 : vector<256x128xf32>
    %9 = arith.select %6, %4, %8 : vector<256x128xi1>, vector<256x128xf32>
    %cst_5 = arith.constant 0.000000e+00 : f32
    %10 = vector.broadcast %cst_5 : f32 to vector<256x128xf32>
    %11 = arith.subf %10, %9 : vector<256x128xf32>
    %12 = math.exp %11 : vector<256x128xf32>
    %13 = arith.mulf %12, %3 : vector<256x128xf32>
    %14 = arith.truncf %13 : vector<256x128xf32> to vector<256x128xbf16>
    %c0_6 = arith.constant 0 : index
    %c0_7 = arith.constant 0 : index
    %15 = vector.load %arg3[%c0_6, %c0_7] : memref<256x128xbf16, #tpu.memory_space<vmem>>, vector<256x128xbf16>
    tpu.vector_store %arg3[%c0_6, %c0_7], %14 {strides = array<i32>} : memref<256x128xbf16, #tpu.memory_space<vmem>>, vector<256x128xbf16>,
    return
  }
  func.func @transform_0(%arg0: i32) -> (i32, i32) {
    %c0_i32 = arith.constant 0 : i32
    %c0_i32_0 = arith.constant 0 : i32
    return %arg0, %c0_i32 : i32, i32
  }
  func.func @transform_1(%arg0: i32) -> (i32, i32) {
    %c0_i32 = arith.constant 0 : i32
    %c0_i32_0 = arith.constant 0 : i32
    %c0_i32_1 = arith.constant 0 : i32
    return %c0_i32, %c0_i32_0 : i32, i32
  }
  func.func @transform_2(%arg0: i32) -> (i32, i32) {
    %c0_i32 = arith.constant 0 : i32
    %c0_i32_0 = arith.constant 0 : i32
    return %arg0, %c0_i32 : i32, i32
  }
}

</mosaic_0001>

<bundles_post_ra>
// kernel: tpu_custom_call.1
= control target key start
LH: loop header
LB: loop body
LE: loop exit
PB: predicated region body
PF: predicated region fallthrough
CT: control target
= control target key end

     0   :  { %7 = vsyncpa [#allocation3], 0  ;;  %s1723_s0 = inlined_call_operand.hbm [shape: bf16[512,128], index: 0, kind: input, shape index: {}]   ;;  %s1724_s1 = inlined_call_operand.hbm [shape: bf16[128,256], index: 1, kind: input, shape index: {}]   ;;  %s1725_s2 = inlined_call_operand.hbm [shape: bf16[512,128], index: 2, kind: output, shape index: {}]  }
   0x1   :  { %9 = vsyncpa [#allocation3 + $0x1], 0 }
   0x2   :  { %10 = vsyncpa [#allocation6], 0 }
   0x3   :  { %11 = vsyncpa [#allocation4], 0 }
   0x4   :  { %13 = vsyncpa [#allocation4 + $0x1], 0  ;;  %s1542_s9 = smov 0   ;;  %s1544_s10 = smov 0  }
   0x5   :  { %s1546_s11 = smov 0   ;;  %s1548_s12 = smov 0  }
   0x6 LB: > { %s1563_s13 = sadd.s32 4294967295, %s1518_s12   ;;  %s972_s14 = sadd.s32 4294967294, %s1518_s12   ;;  %s1518_s12 = sphi %s1548_s12, %s1735_s12   ;;  %s1514_s11 = sphi %s1546_s11, %s1734_s11   ;;  %s1510_s10 = sphi %s1544_s10, %s1733_s10   ;;  %s1506_s9 = sphi %s1542_s9, %s1732_s9  }
   0x7   : > { %p39_p0 = scmp.ne.s32.totalorder %s1510_s10, %s1506_s9  ;;  %p40_p1 = scmp.eq.s32.totalorder %s1563_s13, 0 }
   0x8   : > { %p84_p2 = scmp.eq.s32.totalorder %s1563_s13, 1  ;;  %p90_p3 = scmp.eq.s32.totalorder %s972_s14, 1 }
   0x9   : > { %p1572_p4 = por %p40_p1, %p39_p0  ;;  %p973_p5 = scmp.ge.s32.totalorder %s1518_s12, 1 }
   0xa   : > { %p1577_p6 = por %p90_p3, %p39_p0  ;;  %p97_p7 = scmp.lt.s32.totalorder %s1518_s12, 3 }
   0xb   : > { %s108_s19 = sshll.u32 %s1724_s1, 4  ;;  %s1520_s21 = smov [#allocation5]   ;;  %s109_s19 = int_to_ptr.hbm [resolvable:$true] %s108_s19 }
   0xc   : > { %p1585_p8 = pnand %p973_p5, %p97_p7  ;;  %s110_s22 = sshll.u32 %s1520_s21, 4  ;;  %s111_s22 = int_to_ptr.vmem [resolvable:$true] %s110_s22 }
   0xd   : > { %s1595_s23 = sadd.s32 1, %s1518_s12   ;;  %s1521_s24 = smov 128  }
   0xe   : > { %p1269_p9 = pneg %p1585_p8  ;;  %s1522_s25 = smov 8  }
   0xf   : > { %s23_s26 = ssub.s32 %s1518_s12, %s1595_s23  ;;  %s26_s27 = sadd.s32 1, %s1514_s11 }
  0x10   : > { %p1270_p10 = pnand %p1269_p9, %p40_p1  ;;  %p24_p12 = scmp.eq.s32.totalorder %s23_s26, 0 }
  0x11   : > { %p33_p13 = scmp.ne.s32.totalorder %s1514_s11, %s1510_s10  ;;  %p34_p0 = scmp.eq.s32.totalorder %s1518_s12, 0 }
  0x12   : > { %1272 = dma.hbm_to_vmem [thread:$0]  (!%p1270_p10), %s109_s19, 2048, %s111_s22, [#allocation6], %s1521_s24, %s1521_s24, %s1522_s25  }
  0x13   : > { %p1282_p3 = scmp.lt.s32.totalorder %s1518_s12, 2  ;;  %p35_p5 = por %p34_p0, %p33_p13 }
  0x14   : > { %s1605_s28 = scalar_select %p24_p12, %s1514_s11, %s26_s27  }
  0x15   : > { %p1609_p7 = por %p84_p2, %p33_p13  ;;  %s124_s30 = sand.u32 1, %s1514_s11  }
  0x16   : > { %s1116_s3 = sshll.u32 %s1518_s12, 7  ;;  %s976_s4 = sshll.u32 %s124_s30, 7 }
  0x17   : > { %s133_s7 = scalar_lea.hbm %s1723_s0, %s1116_s3  ;;  %s128_s14 = scalar_lea.vmem [#allocation2], %s976_s4 }
  0x18   : > { %s134_s8 = sshll.u32 %s133_s7, 4  ;;  %s136_s17 = sshll.u32 %s128_s14, 4  ;;  %s135_s8 = int_to_ptr.hbm [resolvable:$true] %s134_s8  ;;  %s137_s17 = int_to_ptr.vmem [resolvable:$true] %s136_s17 }
  0x19   : > { %p1620_p9 = pnand %p1282_p3, %p35_p5  ;;  %s125_s19 = scalar_lea.sflag [#allocation3], %s124_s30 }
  0x1a   : > { %s1418_s21 = sshra.s32 %s135_s8, 4  ;;  %s1425_s26 = scalar_lea.hbm %s1723_s0, 256  ;;  %s1419_s21 = int_to_ptr.hbm [resolvable:$true] %s1418_s21 }
  0x1b   : > { %s1420_s22 = scalar_lea.hbm %s1419_s21, 128  ;;  %p1422_p10 = pneg %p1620_p9 }
  0x1c   : > { %p1421_p2 = scmp.ne.s32.totalorder %s1419_s21, %s1420_s22  ;;  %p1426_p0 = scmp.lt.s32.totalorder %s1419_s21, %s1723_s0 }
  0x1d   : > { %p1427_p3 = scmp.lt.s32.totalorder %s1425_s26, %s1420_s22 }
  0x1e   : > { %p1423_p12 = pnand %p1422_p10, %p1421_p2 }
  0x1f   : > { %p1428_p5 = por %p1427_p3, %p1426_p0 }
  0x20   : > { %p1424_p13 = pneg %p1423_p12 }
  0x22   : > { %p1429_p11 = pnand %p1428_p5, %p1424_p13 }
  0x24   : > { %1432 = shalt.err (!%p1429_p11)
}
  0x25   : > { %s1523_s30 = smov 64   ;;  %s1524_s4 = smov 4  }
  0x26   : > { %1276 = dma.hbm_to_vmem [thread:$0]  (!%p1620_p9), %s135_s8, 2048, %s137_s17, %s125_s19, %s1523_s30, %s1523_s30, %s1524_s4  }
  0x27   : > { %148 = sbr.rel (%p1585_p8) target bundleno = 355 (0x163), region = 28  ;;  %s1637_s5 = sand.u32 (!%p1585_p8), 1, %s1510_s10  }
  0x28   : > { %s980_s6 = sshll.u32 (!%p1585_p8), %s1637_s5, 7  ;;  %s151_s7 = scalar_lea.sflag (!%p1585_p8), [#allocation3], %s1637_s5 }
  0x29   : > { %s1643_s14 = scalar_lea.vmem (!%p1585_p8), [#allocation2], %s980_s6 }
  0x2c   : > { %1493 = dma.done.wait (%p1572_p4), %s151_s7, 2048  }
  0x2d   : > { %1495 = vsyncadd (%p1572_p4), %s151_s7, 4294965248 }
  0x2e   : > { %1497 = dma.done.wait (%p40_p1), [#allocation6], 2048  }
  0x2f   : > { %1499 = vsyncadd (%p40_p1), [#allocation6], 4294965248  ;;  %v1147_v0 = vld [vmem:[#allocation5 + $0x74] sm:$0xf]  ;;  %v1107_v1 = vld [vmem:[#allocation5 + $0x78] sm:$0xf0] }
  0x30   : > { %v1145_v2 = vld [vmem:[#allocation5 + $0x64] sm:$0xf]  ;;  %v1110_v3 = vor.u32 %v1147_v0, %v1107_v1  ;;  %v1099_v4 = vld [vmem:[#allocation5 + $0x68] sm:$0xf0]  ;;  %v1105_v5 = vld [vmem:[#allocation5 + $0x70] sm:$0xf] }
  0x31   : > { %v1148_v6 = vld [vmem:[#allocation5 + $0x74] sm:$0xf0]  ;;  %v1097_v8 = vld [vmem:[#allocation5 + $0x60] sm:$0xf]  ;;  %v1102_v9 = vor.u32 %v1145_v2, %v1099_v4  ;;  %v1146_v10 = vld [vmem:[#allocation5 + $0x64] sm:$0xf0] }
  0x32   : > { %v1106_v7 = vor.u32 %v1148_v6, %v1105_v5  ;;  %496 = vmatpush.bf16.msra.mxu1 %v1110_v3  ;;  %1253 = vmatpush.bf16.msra.mxu3 %v1110_v3  ;;  %v1143_v11 = vld [vmem:[#allocation5 + $0x54] sm:$0xf]  ;;  %v1091_v12 = vld [vmem:[#allocation5 + $0x58] sm:$0xf0]  ;;  %v1098_v13 = vor.u32 %v1146_v10, %v1097_v8  ;;  %v1089_v14 = vld [vmem:[#allocation5 + $0x50] sm:$0xf] }
  0x33   : > { %v1144_v15 = vld [vmem:[#allocation5 + $0x54] sm:$0xf0]  ;;  %v1094_v16 = vor.u32 %v1143_v11, %v1091_v12  ;;  %v1141_v17 = vld [vmem:[#allocation5 + $0x44] sm:$0xf]  ;;  %v1083_v18 = vld [vmem:[#allocation5 + $0x48] sm:$0xf0] }
  0x34   : > { %1245 = vmatpush.bf16.msra.mxu2 %v1106_v7  ;;  %407 = vmatpush.bf16.msra.mxu0 %v1106_v7  ;;  %v1090_v19 = vor.u32 %v1144_v15, %v1089_v14  ;;  %v1081_v20 = vld [vmem:[#allocation5 + $0x40] sm:$0xf]  ;;  %v1142_v21 = vld [vmem:[#allocation5 + $0x44] sm:$0xf0]  ;;  %v1086_v22 = vor.u32 %v1141_v17, %v1083_v18  ;;  %v1139_v23 = vld [vmem:[#allocation5 + $0x34] sm:$0xf] }
  0x35   : > { %v1075_v24 = vld [vmem:[#allocation5 + $0x38] sm:$0xf0]  ;;  %v1082_v25 = vor.u32 %v1142_v21, %v1081_v20  ;;  %v1073_v26 = vld [vmem:[#allocation5 + $0x30] sm:$0xf]  ;;  %v1140_v27 = vld [vmem:[#allocation5 + $0x34] sm:$0xf0] }
  0x36   : > { %497 = vmatpush.bf16.msra.mxu1 %v1102_v9  ;;  %1254 = vmatpush.bf16.msra.mxu3 %v1102_v9  ;;  %v1078_v28 = vor.u32 %v1139_v23, %v1075_v24  ;;  %v1137_v29 = vld [vmem:[#allocation5 + $0x24] sm:$0xf]  ;;  %v1067_v30 = vld [vmem:[#allocation5 + $0x28] sm:$0xf0]  ;;  %v1074_v31 = vor.u32 %v1140_v27, %v1073_v26  ;;  %v1065_v32 = vld [vmem:[#allocation5 + $0x20] sm:$0xf] }
  0x37   : > { %v1138_v33 = vld [vmem:[#allocation5 + $0x24] sm:$0xf0]  ;;  %v1070_v34 = vor.u32 %v1137_v29, %v1067_v30  ;;  %v1135_v35 = vld [vmem:[#allocation5 + $0x14] sm:$0xf]  ;;  %v1059_v36 = vld [vmem:[#allocation5 + $0x18] sm:$0xf0] }
  0x38   : > { %1246 = vmatpush.bf16.msra.mxu2 %v1098_v13  ;;  %408 = vmatpush.bf16.msra.mxu0 %v1098_v13  ;;  %v1066_v37 = vor.u32 %v1138_v33, %v1065_v32  ;;  %v1057_v38 = vld [vmem:[#allocation5 + $0x10] sm:$0xf]  ;;  %v1136_v39 = vld [vmem:[#allocation5 + $0x14] sm:$0xf0]  ;;  %v1062_v40 = vor.u32 %v1135_v35, %v1059_v36  ;;  %v1133_v41 = vld [vmem:[#allocation5 + $0x4] sm:$0xf] }
  0x39   : > { %v1051_v42 = vld [vmem:[#allocation5 + $0x8] sm:$0xf0]  ;;  %v1058_v43 = vor.u32 %v1136_v39, %v1057_v38  ;;  %v1049_v44 = vld [vmem:[#allocation5] sm:$0xf]  ;;  %v1134_v45 = vld [vmem:[#allocation5 + $0x4] sm:$0xf0] }
  0x3a   : > { %498 = vmatpush.bf16.msra.mxu1 %v1094_v16  ;;  %1255 = vmatpush.bf16.msra.mxu3 %v1094_v16  ;;  %v1054_v46 = vor.u32 %v1133_v41, %v1051_v42  ;;  %v1050_v47 = vor.u32 %v1134_v45, %v1049_v44  ;;  %v1117_v48 = vld [vmem:[%s1643_s14] sm:$0xff]  ;;  %v1118_v50 = vld [vmem:[%s1643_s14 + $0x8] sm:$0xff]  ;;  %v1119_v52 = vld [vmem:[%s1643_s14 + $0x10] sm:$0xff]  ;;  %s1671_s15 = scalar_lea.vmem [#allocation7], %s980_s6  ;;  %s1149_s20 = sshll.u32 %s1563_s13, 7 }
  0x3b   : > { %v1125_v49 = vld [vmem:[%s1643_s14 + $0x40] sm:$0xff]  ;;  %v1126_v51 = vld [vmem:[%s1643_s14 + $0x48] sm:$0xff]  ;;  %v1127_v53 = vld [vmem:[%s1643_s14 + $0x50] sm:$0xff]  ;;  %s885_s18 = scalar_lea.hbm %s1725_s2, %s1149_s20  ;;  %s886_s19 = sshll.u32 %s1671_s15, 4  ;;  %s887_s19 = int_to_ptr.vmem [resolvable:$true] %s886_s19 }
  0x3c   : > { %1247 = vmatpush.bf16.msra.mxu2 %v1090_v19  ;;  %409 = vmatpush.bf16.msra.mxu0 %v1090_v19  ;;  %v1120_v54 = vld [vmem:[%s1643_s14 + $0x18] sm:$0xff]  ;;  %v1121_v56 = vld [vmem:[%s1643_s14 + $0x20] sm:$0xff]  ;;  %v1122_v58 = vld [vmem:[%s1643_s14 + $0x28] sm:$0xff]  ;;  %s888_s21 = sshll.u32 %s885_s18, 4  ;;  %s874_s13 = scalar_lea.sflag [#allocation4], %s1637_s5  ;;  %s889_s21 = int_to_ptr.hbm [resolvable:$true] %s888_s21 }
  0x3d   : > { %v1128_v55 = vld [vmem:[%s1643_s14 + $0x58] sm:$0xff]  ;;  %v1129_v57 = vld [vmem:[%s1643_s14 + $0x60] sm:$0xff]  ;;  %v1130_v59 = vld [vmem:[%s1643_s14 + $0x68] sm:$0xff]  ;;  %s1462_s22 = sshra.s32 %s889_s21, 4  ;;  %s1468_s27 = scalar_lea.hbm %s1725_s2, 256  ;;  %s1463_s22 = int_to_ptr.hbm [resolvable:$true] %s1462_s22 }
  0x3e   : > { %499 = vmatpush.bf16.msra.mxu1 %v1086_v22  ;;  %1256 = vmatpush.bf16.msra.mxu3 %v1086_v22  ;;  %v1123_v60 = vld [vmem:[%s1643_s14 + $0x30] sm:$0xff]  ;;  %v1124_v62 = vld [vmem:[%s1643_s14 + $0x38] sm:$0xff]  ;;  %s1464_s24 = scalar_lea.hbm %s1463_s22, 128  ;;  %p1469_p11 = scmp.lt.s32.totalorder %s1463_s22, %s1725_s2 }
  0x3f   : > { %v1131_v61 = vld [vmem:[%s1643_s14 + $0x70] sm:$0xff]  ;;  %v1132_v63 = vld [vmem:[%s1643_s14 + $0x78] sm:$0xff]  ;;  %p1465_p1 = scmp.ne.s32.totalorder %s1463_s22, %s1464_s24  ;;  %p1470_p9 = scmp.lt.s32.totalorder %s1468_s27, %s1464_s24 }
  0x40   : > { %1248 = vmatpush.bf16.msra.mxu2 %v1082_v25  ;;  %410 = vmatpush.bf16.msra.mxu0 %v1082_v25 }
  0x41   : > { %p1466_p4 = pnand %p1465_p1, %p1609_p7  ;;  %p1471_p2 = por %p1470_p9, %p1469_p11 }
  0x42   : > { %500 = vmatpush.bf16.msra.mxu1 %v1078_v28  ;;  %1257 = vmatpush.bf16.msra.mxu3 %v1078_v28 }
  0x43   : > { %p1467_p8 = pneg %p1466_p4 }
  0x44   : > { %1249 = vmatpush.bf16.msra.mxu2 %v1074_v31  ;;  %411 = vmatpush.bf16.msra.mxu0 %v1074_v31 }
  0x45   : > { %p1472_p10 = pnand %p1471_p2, %p1467_p8 }
  0x46   : > { %501 = vmatpush.bf16.msra.mxu1 %v1070_v34  ;;  %1258 = vmatpush.bf16.msra.mxu3 %v1070_v34 }
  0x48   : > { %1250 = vmatpush.bf16.msra.mxu2 %v1066_v37  ;;  %412 = vmatpush.bf16.msra.mxu0 %v1066_v37 }
  0x4a   : > { %502 = vmatpush.bf16.msra.mxu1 %v1062_v40  ;;  %1259 = vmatpush.bf16.msra.mxu3 %v1062_v40 }
  0x4c   : > { %1251 = vmatpush.bf16.msra.mxu2 %v1058_v43  ;;  %413 = vmatpush.bf16.msra.mxu0 %v1058_v43 }
  0x4e   : > { %503 = vmatpush.bf16.msra.mxu1 %v1054_v46  ;;  %1260 = vmatpush.bf16.msra.mxu3 %v1054_v46 }
  0x50   : > { %1252 = vmatpush.bf16.msra.mxu2 %v1050_v47  ;;  %414 = vmatpush.bf16.msra.mxu0 %v1050_v47 }
  0x51   : > { %504 = vmatmul.bf16.vlgmr.msra.gmra.mxu1 %v1117_v48  ;;  %544 = vmatmul.bf16.vlgmr.msra.gmra.mxu3 %v1125_v49 }
  0x53   : > { %455 = vmatmul.bf16.vlgmr.msra.gmra.mxu2 %v1125_v49  ;;  %415 = vmatmul.bf16.vlgmr.msra.gmra.mxu0 %v1117_v48 }
  0x61   : > { %509 = vmatmul.bf16.gmra.mxu1 %v1118_v50  ;;  %549 = vmatmul.bf16.gmra.mxu3 %v1126_v51 }
  0x63   : > { %460 = vmatmul.bf16.gmra.mxu2 %v1126_v51  ;;  %420 = vmatmul.bf16.gmra.mxu0 %v1118_v50 }
  0x71   : > { %514 = vmatmul.bf16.gmra.mxu1 %v1119_v52  ;;  %554 = vmatmul.bf16.gmra.mxu3 %v1127_v53 }
  0x73   : > { %465 = vmatmul.bf16.gmra.mxu2 %v1127_v53  ;;  %425 = vmatmul.bf16.gmra.mxu0 %v1119_v52 }
  0x81   : > { %519 = vmatmul.bf16.gmra.mxu1 %v1120_v54  ;;  %559 = vmatmul.bf16.gmra.mxu3 %v1128_v55 }
  0x83   : > { %470 = vmatmul.bf16.gmra.mxu2 %v1128_v55  ;;  %430 = vmatmul.bf16.gmra.mxu0 %v1120_v54 }
  0x91   : > { %524 = vmatmul.bf16.gmra.mxu1 %v1121_v56  ;;  %564 = vmatmul.bf16.gmra.mxu3 %v1129_v57 }
  0x93   : > { %475 = vmatmul.bf16.gmra.mxu2 %v1129_v57  ;;  %435 = vmatmul.bf16.gmra.mxu0 %v1121_v56 }
  0xa1   : > { %529 = vmatmul.bf16.gmra.mxu1 %v1122_v58  ;;  %569 = vmatmul.bf16.gmra.mxu3 %v1130_v59 }
  0xa3   : > { %480 = vmatmul.bf16.gmra.mxu2 %v1130_v59  ;;  %440 = vmatmul.bf16.gmra.mxu0 %v1122_v58 }
  0xb1   : > { %534 = vmatmul.bf16.gmra.mxu1 %v1123_v60  ;;  %574 = vmatmul.bf16.gmra.mxu3 %v1131_v61 }
  0xb3   : > { %485 = vmatmul.bf16.gmra.mxu2 %v1131_v61  ;;  %445 = vmatmul.bf16.gmra.mxu0 %v1123_v60 }
  0xc1   : > { %539 = vmatmul.bf16.gmra.mxu1 %v1124_v62  ;;  %579 = vmatmul.bf16.gmra.mxu3 %v1132_v63 }
  0xc3   : > { %490 = vmatmul.bf16.gmra.mxu2 %v1132_v63  ;;  %450 = vmatmul.bf16.gmra.mxu0 %v1124_v62 }
  0xce   : > { %v505_v0 = vpop.f32.mrf.mxu1 }
  0xcf   : > { %vm585_vm0 = vcmp.ge.f32.partialorder %v505_v0, 0.0  ;;  %v617_v1 = vmul.f32 0.2, %v505_v0 }
  0xd0   : > { %v416_v2 = vpop.f32.mrf.mxu0 }
  0xd1   : > { %v649_v3 = vsel %vm585_vm0, %v505_v0, %v617_v1 }
  0xd2   : > { %v681_v4 = vsub.f32 0.0, %v649_v3 }
  0xd4   : > { %v545_v5 = vpop.f32.mrf.mxu3  ;;  %v713_v12 = vmul.f32 1.442695, %v681_v4 }
  0xd5   : > { %vm601_vm1 = vcmp.ge.f32.partialorder %v545_v5, 0.0  ;;  %v633_v6 = vmul.f32 0.2, %v545_v5 }
  0xd6   : > { %v456_v7 = vpop.f32.mrf.mxu2  ;;  %v507_v8 = vpop.f32.mrf.mxu1  ;;  %1324 = vpow2.f32 %v713_v12 }
  0xd7   : > { %v665_v9 = vsel %vm601_vm1, %v545_v5, %v633_v6  ;;  %vm586_vm2 = vcmp.ge.f32.partialorder %v507_v8, 0.0  ;;  %v618_v10 = vmul.f32 0.2, %v507_v8 }
  0xd8   : > { %v418_v11 = vpop.f32.mrf.mxu0  ;;  %v697_v14 = vsub.f32 0.0, %v665_v9 }
  0xd9   : > { %v650_v13 = vsel %vm586_vm2, %v507_v8, %v618_v10 }
  0xda   : > { %v682_v15 = vsub.f32 0.0, %v650_v13  ;;  %v745_v20 = vmul.f32 1.442695, %v697_v14 }
  0xdc   : > { %v715_v16 = vmul.f32 1.442695, %v682_v15  ;;  %v547_v17 = vpop.f32.mrf.mxu3  ;;  %v1325_v27 = vpop.eup %1324 }
  0xdd   : > { %vm602_vm3 = vcmp.ge.f32.partialorder %v547_v17, 0.0  ;;  %v634_v18 = vmul.f32 0.2, %v547_v17  ;;  %v777_v32 = vmul.f32 %v1325_v27, %v416_v2 }
  0xde   : > { %v458_v19 = vpop.f32.mrf.mxu2  ;;  %1326 = vpow2.f32 %v715_v16  ;;  %v510_v21 = vpop.f32.mrf.mxu1 }
  0xdf   : > { %v666_v22 = vsel %vm602_vm3, %v547_v17, %v634_v18  ;;  %vm587_vm4 = vcmp.ge.f32.partialorder %v510_v21, 0.0  ;;  %v619_v23 = vmul.f32 0.2, %v510_v21  ;;  %1328 = vpow2.f32 %v745_v20 }
  0xe0   : > { %v421_v24 = vpop.f32.mrf.mxu0  ;;  %v698_v25 = vsub.f32 0.0, %v666_v22 }
  0xe1   : > { %v651_v26 = vsel %vm587_vm4, %v510_v21, %v619_v23 }
  0xe2   : > { %v747_v28 = vmul.f32 1.442695, %v698_v25  ;;  %v683_v30 = vsub.f32 0.0, %v651_v26 }
  0xe4   : > { %v1327_v29 = vpop.eup %1326  ;;  %1330 = vpow2.f32 %v747_v28  ;;  %v550_v31 = vpop.f32.mrf.mxu3  ;;  %v717_v42 = vmul.f32 1.442695, %v683_v30 }
  0xe5   : > { %v778_v33 = vmul.f32 %v1327_v29, %v418_v11  ;;  %vm603_vm5 = vcmp.ge.f32.partialorder %v550_v31, 0.0  ;;  %v635_v34 = vmul.f32 0.2, %v550_v31  ;;  %v1329_v41 = vpop.eup %1328 }
  0xe6   : > { %v461_v35 = vpop.f32.mrf.mxu2  ;;  %v512_v36 = vpop.f32.mrf.mxu1  ;;  %v793_v47 = vmul.f32 %v1329_v41, %v456_v7  ;;  %1332 = vpow2.f32 %v717_v42 }
  0xe7   : > { %v1153_v37 = vpack.c.bf16 %v778_v33, %v777_v32  ;;  %v667_v38 = vsel %vm603_vm5, %v550_v31, %v635_v34  ;;  %vm588_vm6 = vcmp.ge.f32.partialorder %v512_v36, 0.0  ;;  %v620_v39 = vmul.f32 0.2, %v512_v36 }
  0xe8   : > { %v423_v40 = vpop.f32.mrf.mxu0  ;;  %v699_v45 = vsub.f32 0.0, %v667_v38 }
  0xe9   : > { %1154 = vst [vmem:[%s1671_s15] sm:$0xff] %v1153_v37   ;;  %v652_v43 = vsel %vm588_vm6, %v512_v36, %v620_v39 }
  0xea   : > { %v1331_v44 = vpop.eup %1330  ;;  %v684_v46 = vsub.f32 0.0, %v652_v43  ;;  %v749_v54 = vmul.f32 1.442695, %v699_v45 }
  0xeb   : > { %v794_v48 = vmul.f32 %v1331_v44, %v458_v19 }
  0xec   : > { %v719_v49 = vmul.f32 1.442695, %v684_v46  ;;  %v552_v50 = vpop.f32.mrf.mxu3  ;;  %v1333_v61 = vpop.eup %1332 }
  0xed   : > { %v1193_v51 = vpack.c.bf16 %v794_v48, %v793_v47  ;;  %vm604_vm7 = vcmp.ge.f32.partialorder %v552_v50, 0.0  ;;  %v636_v52 = vmul.f32 0.2, %v552_v50  ;;  %v779_v2 = vmul.f32 %v1333_v61, %v421_v24 }
  0xee   : > { %v463_v53 = vpop.f32.mrf.mxu2  ;;  %1334 = vpow2.f32 %v719_v49  ;;  %v515_v55 = vpop.f32.mrf.mxu1 }
  0xef   : > { %1237 = vst [vmem:[%s1671_s15 + $0x40] sm:$0xff] %v1193_v51   ;;  %v668_v56 = vsel %vm604_vm7, %v552_v50, %v636_v52  ;;  %vm589_vm8 = vcmp.ge.f32.partialorder %v515_v55, 0.0  ;;  %v621_v57 = vmul.f32 0.2, %v515_v55  ;;  %1336 = vpow2.f32 %v749_v54 }
  0xf0   : > { %v426_v58 = vpop.f32.mrf.mxu0  ;;  %v700_v59 = vsub.f32 0.0, %v668_v56 }
  0xf1   : > { %v653_v60 = vsel %vm589_vm8, %v515_v55, %v621_v57 }
  0xf2   : > { %v751_v62 = vmul.f32 1.442695, %v700_v59  ;;  %v685_v0 = vsub.f32 0.0, %v653_v60 }
  0xf4   : > { %v1335_v63 = vpop.eup %1334  ;;  %1338 = vpow2.f32 %v751_v62  ;;  %v555_v1 = vpop.f32.mrf.mxu3  ;;  %v721_v12 = vmul.f32 1.442695, %v685_v0 }
  0xf5   : > { %v780_v3 = vmul.f32 %v1335_v63, %v423_v40  ;;  %vm605_vm9 = vcmp.ge.f32.partialorder %v555_v1, 0.0  ;;  %v637_v4 = vmul.f32 0.2, %v555_v1  ;;  %v1337_v11 = vpop.eup %1336 }
  0xf6   : > { %v466_v5 = vpop.f32.mrf.mxu2  ;;  %v517_v6 = vpop.f32.mrf.mxu1  ;;  %v795_v17 = vmul.f32 %v1337_v11, %v461_v35  ;;  %1340 = vpow2.f32 %v721_v12 }
  0xf7   : > { %v1158_v7 = vpack.c.bf16 %v780_v3, %v779_v2  ;;  %v669_v8 = vsel %vm605_vm9, %v555_v1, %v637_v4  ;;  %vm590_vm10 = vcmp.ge.f32.partialorder %v517_v6, 0.0  ;;  %v622_v9 = vmul.f32 0.2, %v517_v6 }
  0xf8   : > { %v428_v10 = vpop.f32.mrf.mxu0  ;;  %v701_v15 = vsub.f32 0.0, %v669_v8 }
  0xf9   : > { %1230 = vst [vmem:[%s1671_s15 + $0x8] sm:$0xff] %v1158_v7   ;;  %v654_v13 = vsel %vm590_vm10, %v517_v6, %v622_v9 }
  0xfa   : > { %v1339_v14 = vpop.eup %1338  ;;  %v686_v16 = vsub.f32 0.0, %v654_v13  ;;  %v753_v24 = vmul.f32 1.442695, %v701_v15 }
  0xfb   : > { %v796_v18 = vmul.f32 %v1339_v14, %v463_v53 }
  0xfc   : > { %v723_v19 = vmul.f32 1.442695, %v686_v16  ;;  %v557_v20 = vpop.f32.mrf.mxu3  ;;  %v1341_v31 = vpop.eup %1340 }
  0xfd   : > { %v1198_v21 = vpack.c.bf16 %v796_v18, %v795_v17  ;;  %vm606_vm11 = vcmp.ge.f32.partialorder %v557_v20, 0.0  ;;  %v638_v22 = vmul.f32 0.2, %v557_v20  ;;  %v781_v36 = vmul.f32 %v1341_v31, %v426_v58 }
  0xfe   : > { %v468_v23 = vpop.f32.mrf.mxu2  ;;  %1342 = vpow2.f32 %v723_v19  ;;  %v520_v25 = vpop.f32.mrf.mxu1 }
  0xff   : > { %1238 = vst [vmem:[%s1671_s15 + $0x48] sm:$0xff] %v1198_v21   ;;  %v670_v26 = vsel %vm606_vm11, %v557_v20, %v638_v22  ;;  %vm591_vm12 = vcmp.ge.f32.partialorder %v520_v25, 0.0  ;;  %v623_v27 = vmul.f32 0.2, %v520_v25  ;;  %1344 = vpow2.f32 %v753_v24 }
 0x100   : > { %v431_v28 = vpop.f32.mrf.mxu0  ;;  %v702_v29 = vsub.f32 0.0, %v670_v26 }
 0x101   : > { %v655_v30 = vsel %vm591_vm12, %v520_v25, %v623_v27 }
 0x102   : > { %v755_v32 = vmul.f32 1.442695, %v702_v29  ;;  %v687_v34 = vsub.f32 0.0, %v655_v30 }
 0x104   : > { %v1343_v33 = vpop.eup %1342  ;;  %1346 = vpow2.f32 %v755_v32  ;;  %v560_v35 = vpop.f32.mrf.mxu3  ;;  %v725_v46 = vmul.f32 1.442695, %v687_v34 }
 0x105   : > { %v782_v37 = vmul.f32 %v1343_v33, %v428_v10  ;;  %vm607_vm13 = vcmp.ge.f32.partialorder %v560_v35, 0.0  ;;  %v639_v38 = vmul.f32 0.2, %v560_v35  ;;  %v1345_v45 = vpop.eup %1344 }
 0x106   : > { %v471_v39 = vpop.f32.mrf.mxu2  ;;  %v522_v40 = vpop.f32.mrf.mxu1  ;;  %v797_v51 = vmul.f32 %v1345_v45, %v466_v5  ;;  %1348 = vpow2.f32 %v725_v46 }
 0x107   : > { %v1163_v41 = vpack.c.bf16 %v782_v37, %v781_v36  ;;  %v671_v42 = vsel %vm607_vm13, %v560_v35, %v639_v38  ;;  %vm592_vm14 = vcmp.ge.f32.partialorder %v522_v40, 0.0  ;;  %v624_v43 = vmul.f32 0.2, %v522_v40 }
 0x108   : > { %v433_v44 = vpop.f32.mrf.mxu0  ;;  %v703_v49 = vsub.f32 0.0, %v671_v42 }
 0x109   : > { %1231 = vst [vmem:[%s1671_s15 + $0x10] sm:$0xff] %v1163_v41   ;;  %v656_v47 = vsel %vm592_vm14, %v522_v40, %v624_v43 }
 0x10a   : > { %v1347_v48 = vpop.eup %1346  ;;  %v688_v50 = vsub.f32 0.0, %v656_v47  ;;  %v757_v58 = vmul.f32 1.442695, %v703_v49 }
 0x10b   : > { %v798_v52 = vmul.f32 %v1347_v48, %v468_v23 }
 0x10c   : > { %v727_v53 = vmul.f32 1.442695, %v688_v50  ;;  %v562_v54 = vpop.f32.mrf.mxu3  ;;  %v1349_v1 = vpop.eup %1348 }
 0x10d   : > { %v1203_v55 = vpack.c.bf16 %v798_v52, %v797_v51  ;;  %vm608_vm15 = vcmp.ge.f32.partialorder %v562_v54, 0.0  ;;  %v640_v56 = vmul.f32 0.2, %v562_v54  ;;  %v783_v6 = vmul.f32 %v1349_v1, %v431_v28 }
 0x10e   : > { %v473_v57 = vpop.f32.mrf.mxu2  ;;  %1350 = vpow2.f32 %v727_v53  ;;  %v525_v59 = vpop.f32.mrf.mxu1 }
 0x10f   : > { %1239 = vst [vmem:[%s1671_s15 + $0x50] sm:$0xff] %v1203_v55   ;;  %v672_v60 = vsel %vm608_vm15, %v562_v54, %v640_v56  ;;  %vm593_vm0 = vcmp.ge.f32.partialorder %v525_v59, 0.0  ;;  %v625_v61 = vmul.f32 0.2, %v525_v59  ;;  %1352 = vpow2.f32 %v757_v58 }
 0x110   : > { %v436_v62 = vpop.f32.mrf.mxu0  ;;  %v704_v63 = vsub.f32 0.0, %v672_v60 }
 0x111   : > { %v657_v0 = vsel %vm593_vm0, %v525_v59, %v625_v61 }
 0x112   : > { %v759_v2 = vmul.f32 1.442695, %v704_v63  ;;  %v689_v4 = vsub.f32 0.0, %v657_v0 }
 0x114   : > { %v1351_v3 = vpop.eup %1350  ;;  %1354 = vpow2.f32 %v759_v2  ;;  %v565_v5 = vpop.f32.mrf.mxu3  ;;  %v729_v15 = vmul.f32 1.442695, %v689_v4 }
 0x115   : > { %v784_v7 = vmul.f32 %v1351_v3, %v433_v44  ;;  %vm609_vm1 = vcmp.ge.f32.partialorder %v565_v5, 0.0  ;;  %v641_v8 = vmul.f32 0.2, %v565_v5  ;;  %v1353_v14 = vpop.eup %1352 }
 0x116   : > { %v476_v9 = vpop.f32.mrf.mxu2  ;;  %v527_v10 = vpop.f32.mrf.mxu1  ;;  %v799_v21 = vmul.f32 %v1353_v14, %v471_v39  ;;  %1356 = vpow2.f32 %v729_v15 }
 0x117   : > { %v1168_v11 = vpack.c.bf16 %v784_v7, %v783_v6  ;;  %v673_v12 = vsel %vm609_vm1, %v565_v5, %v641_v8  ;;  %vm594_vm2 = vcmp.ge.f32.partialorder %v527_v10, 0.0  ;;  %v626_v13 = vmul.f32 0.2, %v527_v10 }
 0x118   : > { %v438_v16 = vpop.f32.mrf.mxu0  ;;  %v705_v19 = vsub.f32 0.0, %v673_v12 }
 0x119   : > { %1232 = vst [vmem:[%s1671_s15 + $0x18] sm:$0xff] %v1168_v11   ;;  %v658_v17 = vsel %vm594_vm2, %v527_v10, %v626_v13 }
 0x11a   : > { %v1355_v18 = vpop.eup %1354  ;;  %v690_v20 = vsub.f32 0.0, %v658_v17  ;;  %v761_v27 = vmul.f32 1.442695, %v705_v19 }
 0x11b   : > { %v800_v22 = vmul.f32 %v1355_v18, %v473_v57 }
 0x11c   : > { %v731_v23 = vmul.f32 1.442695, %v690_v20  ;;  %v567_v24 = vpop.f32.mrf.mxu3  ;;  %v1357_v34 = vpop.eup %1356 }
 0x11d   : > { %v1208_v25 = vpack.c.bf16 %v800_v22, %v799_v21  ;;  %vm610_vm3 = vcmp.ge.f32.partialorder %v567_v24, 0.0  ;;  %v642_v26 = vmul.f32 0.2, %v567_v24  ;;  %v785_v40 = vmul.f32 %v1357_v34, %v436_v62 }
 0x11e   : > { %1358 = vpow2.f32 %v731_v23  ;;  %v530_v28 = vpop.f32.mrf.mxu1  ;;  %v478_v29 = vpop.f32.mrf.mxu2 }
 0x11f   : > { %1240 = vst [vmem:[%s1671_s15 + $0x58] sm:$0xff] %v1208_v25   ;;  %v674_v30 = vsel %vm610_vm3, %v567_v24, %v642_v26  ;;  %vm595_vm4 = vcmp.ge.f32.partialorder %v530_v28, 0.0  ;;  %v627_v31 = vmul.f32 0.2, %v530_v28  ;;  %1360 = vpow2.f32 %v761_v27 }
 0x120   : > { %v706_v32 = vsub.f32 0.0, %v674_v30  ;;  %v441_v36 = vpop.f32.mrf.mxu0 }
 0x121   : > { %v659_v33 = vsel %vm595_vm4, %v530_v28, %v627_v31 }
 0x122   : > { %v763_v35 = vmul.f32 1.442695, %v706_v32  ;;  %v691_v38 = vsub.f32 0.0, %v659_v33 }
 0x124   : > { %v1359_v37 = vpop.eup %1358  ;;  %1362 = vpow2.f32 %v763_v35  ;;  %v570_v39 = vpop.f32.mrf.mxu3  ;;  %v733_v48 = vmul.f32 1.442695, %v691_v38 }
 0x125   : > { %v786_v41 = vmul.f32 %v1359_v37, %v438_v16  ;;  %vm611_vm5 = vcmp.ge.f32.partialorder %v570_v39, 0.0  ;;  %v643_v42 = vmul.f32 0.2, %v570_v39  ;;  %v1361_v47 = vpop.eup %1360 }
 0x126   : > { %v532_v43 = vpop.f32.mrf.mxu1  ;;  %v481_v49 = vpop.f32.mrf.mxu2  ;;  %v801_v54 = vmul.f32 %v1361_v47, %v476_v9  ;;  %1364 = vpow2.f32 %v733_v48 }
 0x127   : > { %v1173_v44 = vpack.c.bf16 %v786_v41, %v785_v40  ;;  %v675_v45 = vsel %vm611_vm5, %v570_v39, %v643_v42  ;;  %vm596_vm6 = vcmp.ge.f32.partialorder %v532_v43, 0.0  ;;  %v628_v46 = vmul.f32 0.2, %v532_v43 }
 0x128   : > { %v707_v52 = vsub.f32 0.0, %v675_v45  ;;  %v443_v58 = vpop.f32.mrf.mxu0 }
 0x129   : > { %1233 = vst [vmem:[%s1671_s15 + $0x20] sm:$0xff] %v1173_v44   ;;  %v660_v50 = vsel %vm596_vm6, %v532_v43, %v628_v46 }
 0x12a   : > { %v1363_v51 = vpop.eup %1362  ;;  %v692_v53 = vsub.f32 0.0, %v660_v50  ;;  %v765_v61 = vmul.f32 1.442695, %v707_v52 }
 0x12b   : > { %v802_v55 = vmul.f32 %v1363_v51, %v478_v29 }
 0x12c   : > { %v735_v56 = vmul.f32 1.442695, %v692_v53  ;;  %v572_v57 = vpop.f32.mrf.mxu3  ;;  %v1365_v3 = vpop.eup %1364 }
 0x12d   : > { %v1213_v59 = vpack.c.bf16 %v802_v55, %v801_v54  ;;  %vm612_vm7 = vcmp.ge.f32.partialorder %v572_v57, 0.0  ;;  %v644_v60 = vmul.f32 0.2, %v572_v57  ;;  %v787_v9 = vmul.f32 %v1365_v3, %v441_v36 }
 0x12e   : > { %1366 = vpow2.f32 %v735_v56  ;;  %v535_v62 = vpop.f32.mrf.mxu1  ;;  %v483_v5 = vpop.f32.mrf.mxu2 }
 0x12f   : > { %1241 = vst [vmem:[%s1671_s15 + $0x60] sm:$0xff] %v1213_v59   ;;  %v676_v63 = vsel %vm612_vm7, %v572_v57, %v644_v60  ;;  %vm597_vm8 = vcmp.ge.f32.partialorder %v535_v62, 0.0  ;;  %v629_v0 = vmul.f32 0.2, %v535_v62  ;;  %1368 = vpow2.f32 %v765_v61 }
 0x130   : > { %v708_v1 = vsub.f32 0.0, %v676_v63  ;;  %v446_v13 = vpop.f32.mrf.mxu0 }
 0x131   : > { %v661_v2 = vsel %vm597_vm8, %v535_v62, %v629_v0 }
 0x132   : > { %v767_v4 = vmul.f32 1.442695, %v708_v1  ;;  %v693_v7 = vsub.f32 0.0, %v661_v2 }
 0x134   : > { %v1367_v6 = vpop.eup %1366  ;;  %1370 = vpow2.f32 %v767_v4  ;;  %v575_v8 = vpop.f32.mrf.mxu3  ;;  %v737_v18 = vmul.f32 1.442695, %v693_v7 }
 0x135   : > { %v788_v10 = vmul.f32 %v1367_v6, %v443_v58  ;;  %vm613_vm9 = vcmp.ge.f32.partialorder %v575_v8, 0.0  ;;  %v645_v11 = vmul.f32 0.2, %v575_v8  ;;  %v1369_v17 = vpop.eup %1368 }
 0x136   : > { %v537_v12 = vpop.f32.mrf.mxu1  ;;  %v803_v23 = vmul.f32 %v1369_v17, %v481_v49  ;;  %1372 = vpow2.f32 %v737_v18  ;;  %v486_v26 = vpop.f32.mrf.mxu2 }
 0x137   : > { %v1178_v14 = vpack.c.bf16 %v788_v10, %v787_v9  ;;  %v677_v15 = vsel %vm613_vm9, %v575_v8, %v645_v11  ;;  %vm598_vm10 = vcmp.ge.f32.partialorder %v537_v12, 0.0  ;;  %v630_v16 = vmul.f32 0.2, %v537_v12 }
 0x138   : > { %v709_v21 = vsub.f32 0.0, %v677_v15  ;;  %v448_v35 = vpop.f32.mrf.mxu0 }
 0x139   : > { %1234 = vst [vmem:[%s1671_s15 + $0x28] sm:$0xff] %v1178_v14   ;;  %v662_v19 = vsel %vm598_vm10, %v537_v12, %v630_v16 }
 0x13a   : > { %v1371_v20 = vpop.eup %1370  ;;  %v694_v22 = vsub.f32 0.0, %v662_v19  ;;  %v769_v30 = vmul.f32 1.442695, %v709_v21 }
 0x13b   : > { %v804_v24 = vmul.f32 %v1371_v20, %v483_v5 }
 0x13c   : > { %v739_v25 = vmul.f32 1.442695, %v694_v22  ;;  %v577_v27 = vpop.f32.mrf.mxu3  ;;  %v1373_v37 = vpop.eup %1372 }
 0x13d   : > { %v1218_v28 = vpack.c.bf16 %v804_v24, %v803_v23  ;;  %vm614_vm11 = vcmp.ge.f32.partialorder %v577_v27, 0.0  ;;  %v646_v29 = vmul.f32 0.2, %v577_v27  ;;  %v789_v42 = vmul.f32 %v1373_v37, %v446_v13 }
 0x13e   : > { %1374 = vpow2.f32 %v739_v25  ;;  %v540_v31 = vpop.f32.mrf.mxu1  ;;  %v488_v45 = vpop.f32.mrf.mxu2 }
 0x13f   : > { %1242 = vst [vmem:[%s1671_s15 + $0x68] sm:$0xff] %v1218_v28   ;;  %v678_v32 = vsel %vm614_vm11, %v577_v27, %v646_v29  ;;  %vm599_vm12 = vcmp.ge.f32.partialorder %v540_v31, 0.0  ;;  %v631_v33 = vmul.f32 0.2, %v540_v31  ;;  %1376 = vpow2.f32 %v769_v30 }
 0x140   : > { %v710_v34 = vsub.f32 0.0, %v678_v32  ;;  %v451_v56 = vpop.f32.mrf.mxu0 }
 0x141   : > { %v663_v36 = vsel %vm599_vm12, %v540_v31, %v631_v33 }
 0x142   : > { %v771_v38 = vmul.f32 1.442695, %v710_v34  ;;  %v695_v40 = vsub.f32 0.0, %v663_v36 }
 0x144   : > { %v1375_v39 = vpop.eup %1374  ;;  %1378 = vpow2.f32 %v771_v38  ;;  %v580_v41 = vpop.f32.mrf.mxu3  ;;  %v741_v51 = vmul.f32 1.442695, %v695_v40 }
 0x145   : > { %v790_v43 = vmul.f32 %v1375_v39, %v448_v35  ;;  %vm615_vm13 = vcmp.ge.f32.partialorder %v580_v41, 0.0  ;;  %v647_v44 = vmul.f32 0.2, %v580_v41  ;;  %v1377_v50 = vpop.eup %1376 }
 0x146   : > { %v542_v46 = vpop.f32.mrf.mxu1  ;;  %v805_v57 = vmul.f32 %v1377_v50, %v486_v26  ;;  %1380 = vpow2.f32 %v741_v51  ;;  %v491_v1 = vpop.f32.mrf.mxu2 }
 0x147   : > { %v1183_v47 = vpack.c.bf16 %v790_v43, %v789_v42  ;;  %v679_v48 = vsel %vm615_vm13, %v580_v41, %v647_v44  ;;  %vm600_vm14 = vcmp.ge.f32.partialorder %v542_v46, 0.0  ;;  %v632_v49 = vmul.f32 0.2, %v542_v46 }
 0x148   : > { %v711_v54 = vsub.f32 0.0, %v679_v48  ;;  %v453_v6 = vpop.f32.mrf.mxu0 }
 0x149   : > { %1235 = vst [vmem:[%s1671_s15 + $0x30] sm:$0xff] %v1183_v47   ;;  %v664_v52 = vsel %vm600_vm14, %v542_v46, %v632_v49 }
 0x14a   : > { %v1379_v53 = vpop.eup %1378  ;;  %v696_v55 = vsub.f32 0.0, %v664_v52  ;;  %v773_v63 = vmul.f32 1.442695, %v711_v54 }
 0x14b   : > { %v806_v58 = vmul.f32 %v1379_v53, %v488_v45 }
 0x14c   : > { %v743_v59 = vmul.f32 1.442695, %v696_v55  ;;  %v582_v60 = vpop.f32.mrf.mxu3  ;;  %v1381_v3 = vpop.eup %1380 }
 0x14d   : > { %v1223_v61 = vpack.c.bf16 %v806_v58, %v805_v57  ;;  %vm616_vm15 = vcmp.ge.f32.partialorder %v582_v60, 0.0  ;;  %v648_v62 = vmul.f32 0.2, %v582_v60  ;;  %v791_v7 = vmul.f32 %v1381_v3, %v451_v56 }
 0x14e   : > { %1382 = vpow2.f32 %v743_v59  ;;  %v493_v12 = vpop.f32.mrf.mxu2 }
 0x14f   : > { %1243 = vst [vmem:[%s1671_s15 + $0x70] sm:$0xff] %v1223_v61   ;;  %v680_v0 = vsel %vm616_vm15, %v582_v60, %v648_v62  ;;  %1384 = vpow2.f32 %v773_v63 }
 0x150   : > { %v712_v2 = vsub.f32 0.0, %v680_v0 }
 0x152   : > { %v775_v4 = vmul.f32 1.442695, %v712_v2 }
 0x154   : > { %v1383_v5 = vpop.eup %1382  ;;  %1386 = vpow2.f32 %v775_v4 }
 0x155   : > { %v792_v8 = vmul.f32 %v1383_v5, %v453_v6  ;;  %v1385_v10 = vpop.eup %1384 }
 0x156   : > { %v807_v13 = vmul.f32 %v1385_v10, %v491_v1 }
 0x157   : > { %v1188_v9 = vpack.c.bf16 %v792_v8, %v791_v7 }
 0x159   : > { %1236 = vst [vmem:[%s1671_s15 + $0x38] sm:$0xff] %v1188_v9  }
 0x15a   : > { %v1387_v11 = vpop.eup %1386 }
 0x15b   : > { %v808_v14 = vmul.f32 %v1387_v11, %v493_v12 }
 0x15d   : > { %v1228_v15 = vpack.c.bf16 %v808_v14, %v807_v13 }
 0x15f   : > { %1244 = vst [vmem:[%s1671_s15 + $0x78] sm:$0xff] %v1228_v15  }
 0x160   : > { %1475 = shalt.err (!%p1472_p10)
}
 0x161   : > { %s1525_s4 = smov 64   ;;  %s1526_s5 = smov 4  }
 0x162   : > { %1267 = dma.vmem_to_hbm [thread:$0]  (%p1609_p7), %s887_s19, 2048, %s889_s21, %s874_s13, %s1525_s4, %s1525_s4, %s1526_s5  }
 0x163 PF: > { %s903_s6 = sand.u32 1, %s1506_s9   ;;  %p1731_p12 = scmp.ge.s32.totalorder %s1518_s12, 2 }
 0x164   : > { %s904_s7 = scalar_lea.sflag [#allocation4], %s903_s6 }
 0x165   : > { %p1278_p13 = pnand %p1731_p12, %p1577_p6 }
 0x167   : > { %p1279_p0 = pneg %p1278_p13 }
 0x169   : > { %1501 = dma.done.wait (%p1279_p0), %s904_s7, 2048  }
 0x16a   : > { %1503 = vsyncadd (%p1279_p0), %s904_s7, 4294965248  ;;  %p16_p3 = scmp.ge.s32.totalorder %s1595_s23, 4   ;;  %s1732_s9 = smov %s1510_s10 }
 0x16b   : > { %s1733_s10 = smov %s1514_s11  ;;  %s1734_s11 = smov %s1605_s28 }
 0x16c   : > { %s1735_s12 = smov %s1595_s23  ;;  %18 = sbr.rel (!%p16_p3) target bundleno = 6 (0x6), region = 77 }
 0x171   :  { %910 = vsyncpa [#allocation3], 1 }
 0x172   :  { %912 = vsyncpa [#allocation3 + $0x1], 1 }
 0x173   :  { %913 = vsyncpa [#allocation6], 1 }
 0x174   :  { %914 = vsyncpa [#allocation4], 1 }
 0x175   :  { %916 = vsyncpa [#allocation4 + $0x1], 1 }

</bundles_post_ra>
